<compile_context>
chip_gen: v6e
topology: v6e:2x2x1
jax: 0.10.0
libtpu: 0.0.40
codegen_flags: <defaults>
</compile_context>

<pallas_src>
import functools

import jax
import jax.numpy as jnp
from jax.experimental import pallas as pl
from jax.experimental.pallas import tpu as pltpu

LANES = 128
MAX_BLOCK_BYTES = 4 * 1024 * 1024    # per-input, per-pipeline-buffer block size
SUBLANE_PACK = 32                    # sublane granularity safe for f32/bf16/int8
VMEM_LIMIT_BYTES = 32 * 1024 * 1024  # 2 inputs x 2 bufs x 4 MiB = 16 MiB << limit


def _round_up(v, m):
    return ((v + m - 1) // m) * m


def _num_tensorcores():
    # v7x (and v4/v5p megacore) have 2 TensorCores per chip; v5e/v6e have 1.
    # A wrong guess only costs a sliver of perf (harmless serial size-2 split
    # or a missed 2-way split), never correctness.
    try:
        kind = jax.devices()[0].device_kind.lower()
    except Exception:
        return 2
    if "v5 lite" in kind or "v5e" in kind or "v6" in kind:
        return 1
    return 2


def _profit_reversed_kernel(x_ref, y_ref, o_ref, acc_ref, *,
                            block_rows, blocks_per_core, last_block,
                            tail_valid, has_phantom):
    c = pl.program_id(0)   # core-split axis ("parallel")
    i = pl.program_id(1)   # reduction axis   ("arbitrary")

    @pl.when(i == 0)
    def _():
        acc_ref[...] = jnp.zeros_like(acc_ref)

    # Compare in f32: reuses the upcast needed for accumulation anyway and
    # keeps the VALU stream clean on v5e (no native bf16 compare there).
    xf = x_ref[...].astype(jnp.float32)
    yf = y_ref[...].astype(jnp.float32)
    sel = xf < yf
    interior = jnp.where(sel, xf, 0.0)

    def accumulate(contrib):
        # vreg-shaped partial sum: fold row groups with plain VPU adds; the
        # expensive cross-lane/sublane reduce happens once at finalize.
        acc_ref[...] += jnp.sum(
            contrib.reshape(block_rows // 8, 8, LANES), axis=0)

    vblk = c * blocks_per_core + i
    tail_is_partial = tail_valid < block_rows * LANES

    if tail_is_partial:
        # Interior blocks: cmp + select + adds only, no masking.
        @pl.when(vblk < last_block)
        def _():
            accumulate(interior)

        # Tail block: mask with a constant within-block iota against the
        # static count of valid elements in that block (fits int32 by
        # construction, independent of the total element count).
        @pl.when(vblk == last_block)
        def _():
            flat = (jax.lax.broadcasted_iota(
                        jnp.int32, (block_rows, LANES), 0) * LANES
                    + jax.lax.broadcasted_iota(
                        jnp.int32, (block_rows, LANES), 1))
            accumulate(jnp.where(jnp.logical_and(sel, flat < tail_valid),
                                 xf, 0.0))
    elif has_phantom:
        # Full tail, but the rectangular grid has phantom steps past the end.
        @pl.when(vblk <= last_block)
        def _():
            accumulate(interior)
    else:
        accumulate(interior)

    @pl.when(i == pl.num_programs(1) - 1)
    def _():
        o_ref[...] = jnp.sum(acc_ref[...]).reshape(1, 1, 1)


def profit_reversed(x, y):
    """Pallas implementation of ProfitReversed.forward(x, y) -> scalar."""
    x_flat = jnp.ravel(x)
    y_flat = jnp.ravel(y)
    n = x_flat.shape[0]
    assert y_flat.shape[0] == n, "x and y must have the same number of elements"
    if n == 0:
        return jnp.zeros((), x.dtype)

    rows = pl.cdiv(n, LANES)
    n_lane_aligned = rows * LANES
    if n_lane_aligned != n:
        # TODO(synk): for production shapes whose flattened size is already a
        # 128-multiple this branch is skipped and ravel/reshape are free views;
        # only awkward shapes pay for this one-off pad copy.
        pad = n_lane_aligned - n
        x_flat = jnp.pad(x_flat, (0, pad))
        y_flat = jnp.pad(y_flat, (0, pad))
    x2 = x_flat.reshape(rows, LANES)
    y2 = y_flat.reshape(rows, LANES)

    itemsize = jnp.dtype(x2.dtype).itemsize
    # Byte-constant blocks: bf16 gets 2x the rows of f32, int8 4x, so every
    # dtype moves the same HBM bytes per grid step.
    max_rows_by_bytes = max(SUBLANE_PACK, MAX_BLOCK_BYTES // (LANES * itemsize))
    block_rows = min(max_rows_by_bytes, _round_up(rows, SUBLANE_PACK))

    total_blocks = pl.cdiv(rows, block_rows)
    num_cores = 1 if total_blocks < 2 else _num_tensorcores()
    blocks_per_core = pl.cdiv(total_blocks, num_cores)
    last_block = total_blocks - 1
    has_phantom = num_cores * blocks_per_core > total_blocks
    tail_valid = n - last_block * block_rows * LANES   # static Python int

    def in_map(c, i):
        # Clamp the (at most one) phantom block onto the last real block; it
        # immediately follows that same block in its core's program order, so
        # the pipeline skips the redundant DMA and the kernel skips its
        # compute via pl.when.
        return (jnp.minimum(c * blocks_per_core + i, last_block), 0)

    def out_map(c, i):
        return (c, 0, 0)

    kernel = functools.partial(
        _profit_reversed_kernel,
        block_rows=block_rows,
        blocks_per_core=blocks_per_core,
        last_block=last_block,
        tail_valid=tail_valid,
        has_phantom=has_phantom,
    )

    cost = pl.CostEstimate(
        flops=3 * n,
        transcendentals=0,
        bytes_accessed=2 * n * itemsize + num_cores * 4,
    )

    partials = pl.pallas_call(
        kernel,
        out_shape=jax.ShapeDtypeStruct((num_cores, 1, 1), jnp.float32),
        grid_spec=pltpu.PrefetchScalarGridSpec(
            num_scalar_prefetch=0,
            grid=(num_cores, blocks_per_core),
            in_specs=[
                pl.BlockSpec((block_rows, LANES), in_map),
                pl.BlockSpec((block_rows, LANES), in_map),
            ],
            out_specs=pl.BlockSpec((1, 1, 1), out_map),
            scratch_shapes=[pltpu.VMEM((8, LANES), jnp.float32)],
        ),
        compiler_params=pltpu.CompilerParams(
            dimension_semantics=("parallel", "arbitrary"),
            vmem_limit_bytes=VMEM_LIMIT_BYTES,
        ),
        cost_estimate=cost,
    )(x2, y2)

    profit = jnp.sum(partials)
    return (-profit).astype(x.dtype)


if __name__ == "__main__":
    key = jax.random.PRNGKey(0)
    kx, ky = jax.random.split(key)

    def ref_fn(a, b):
        af = jnp.ravel(a).astype(jnp.float32)
        bf = jnp.ravel(b).astype(jnp.float32)
        return -jnp.sum(jnp.where(af < bf, af, 0.0))

    # forecasting-style output (B, L, C) — lane-aligned single block
    x = jax.random.normal(kx, (2, 16, 4), dtype=jnp.float32)
    y = jax.random.normal(ky, (2, 16, 4), dtype=jnp.float32)
    out = profit_reversed(x, y)
    jax.block_until_ready(out)
    assert jnp.allclose(out, ref_fn(x, y), rtol=1e-5, atol=1e-5), (out, ref_fn(x, y))

    # non-lane-aligned element count exercises the pad + tail-mask path
    x2 = jax.random.normal(kx, (3, 7, 5), dtype=jnp.float32)
    y2 = jax.random.normal(ky, (3, 7, 5), dtype=jnp.float32)
    out2 = profit_reversed(x2, y2)
    jax.block_until_ready(out2)
    assert jnp.allclose(out2, ref_fn(x2, y2), rtol=1e-5, atol=1e-5), (out2, ref_fn(x2, y2))

    # bf16 inputs stay bf16 into the kernel (f32 accumulation, cast back out)
    xb = jax.random.normal(kx, (4, 8, 32), dtype=jnp.bfloat16)
    yb = jax.random.normal(ky, (4, 8, 32), dtype=jnp.bfloat16)
    outb = profit_reversed(xb, yb)
    jax.block_until_ready(outb)
    assert outb.dtype == jnp.bfloat16
    assert jnp.allclose(outb.astype(jnp.float32), ref_fn(xb, yb),
                        rtol=2e-2, atol=2e-2), (outb, ref_fn(xb, yb))

    # multi-block case: exercises unmasked interior blocks + masked tail block
    # (and the 2-way core split when running on a 2-TensorCore chip)
    xm = jax.random.normal(kx, (1100, 1000), dtype=jnp.float32)
    ym = jax.random.normal(ky, (1100, 1000), dtype=jnp.float32)
    outm = profit_reversed(xm, ym)
    jax.block_until_ready(outm)
    refm = ref_fn(xm, ym)
    assert jnp.allclose(outm, refm, rtol=1e-4, atol=1e-2), (outm, refm)

    print("KERNEL_OK")
</pallas_src>

<mosaic_0001>
module attributes {stable_mosaic.version = 11 : i64} {
  func.func @_profit_reversed_kernel(%arg0: i32, %arg1: i32, %arg2: memref<32x128xf32, #tpu.memory_space<vmem>>, %arg3: memref<32x128xf32, #tpu.memory_space<vmem>>, %arg4: memref<1x1x1xf32, #tpu.memory_space<vmem>>, %arg5: memref<8x128xf32, #tpu.memory_space<vmem>>) attributes {dimension_semantics = [#tpu.dimension_semantics<parallel>, #tpu.dimension_semantics<arbitrary>], iteration_bounds = array<i64: 1, 1>, scalar_prefetch = 0 : i64, scratch_operands = 1 : i64, tpu.core_type = #tpu.core_type<tc>, window_params = [{transform_indices = @transform_0, window_bounds = array<i64: 32, 128>}, {transform_indices = @transform_1, window_bounds = array<i64: 32, 128>}, {transform_indices = @transform_2, window_bounds = array<i64: 1, 1, 1>}]} {
    %c0_i32 = arith.constant 0 : i32
    %0 = arith.cmpi eq, %arg1, %c0_i32 : i32
    %1 = arith.extui %0 : i1 to i32
    %c0_i32_0 = arith.constant 0 : i32
    %2 = arith.cmpi ne, %1, %c0_i32_0 : i32
    scf.if %2 {
      %cst_10 = arith.constant 0.000000e+00 : f32
      %19 = vector.broadcast %cst_10 : f32 to vector<8x128xf32>
      %c0_11 = arith.constant 0 : index
      %c0_12 = arith.constant 0 : index
      %20 = vector.load %arg5[%c0_11, %c0_12] : memref<8x128xf32, #tpu.memory_space<vmem>>, vector<8x128xf32>
      tpu.vector_store %arg5[%c0_11, %c0_12], %19 {strides = array<i32>} : memref<8x128xf32, #tpu.memory_space<vmem>>, vector<8x128xf32>,
    } else {
    }
    %c0 = arith.constant 0 : index
    %c0_1 = arith.constant 0 : index
    %3 = vector.load %arg2[%c0, %c0_1] : memref<32x128xf32, #tpu.memory_space<vmem>>, vector<32x128xf32>
    %c0_2 = arith.constant 0 : index
    %c0_3 = arith.constant 0 : index
    %4 = vector.load %arg3[%c0_2, %c0_3] : memref<32x128xf32, #tpu.memory_space<vmem>>, vector<32x128xf32>
    %5 = arith.cmpf olt, %3, %4 : vector<32x128xf32>
    %cst = arith.constant 0.000000e+00 : f32
    %6 = vector.broadcast %cst : f32 to vector<32x128xf32>
    %7 = arith.select %5, %3, %6 : vector<32x128xi1>, vector<32x128xf32>
    %c1_i32 = arith.constant 1 : i32
    %8 = arith.muli %arg0, %c1_i32 : i32
    %9 = arith.addi %8, %arg1 : i32
    %c0_i32_4 = arith.constant 0 : i32
    %10 = arith.cmpi slt, %9, %c0_i32_4 : i32
    %11 = arith.extui %10 : i1 to i32
    %c0_i32_5 = arith.constant 0 : i32
    %12 = arith.cmpi ne, %11, %c0_i32_5 : i32
    scf.if %12 {
      %c0_10 = arith.constant 0 : index
      %c0_11 = arith.constant 0 : index
      %19 = vector.load %arg5[%c0_10, %c0_11] : memref<8x128xf32, #tpu.memory_space<vmem>>, vector<8x128xf32>
      %20 = vector.shape_cast %7 : vector<32x128xf32> to vector<4x8x128xf32>
      %cst_12 = arith.constant dense<0.000000e+00> : vector<8x128xf32>
      %21 = vector.multi_reduction <add>, %20, %cst_12 [0] : vector<4x8x128xf32> to vector<8x128xf32>
      %22 = arith.addf %19, %21 : vector<8x128xf32>
      %c0_13 = arith.constant 0 : index
      %c0_14 = arith.constant 0 : index
      %23 = vector.load %arg5[%c0_13, %c0_14] : memref<8x128xf32, #tpu.memory_space<vmem>>, vector<8x128xf32>
      tpu.vector_store %arg5[%c0_13, %c0_14], %22 {strides = array<i32>} : memref<8x128xf32, #tpu.memory_space<vmem>>, vector<8x128xf32>,
    } else {
    }
    %c0_i32_6 = arith.constant 0 : i32
    %13 = arith.cmpi eq, %9, %c0_i32_6 : i32
    %14 = arith.extui %13 : i1 to i32
    %c0_i32_7 = arith.constant 0 : i32
    %15 = arith.cmpi ne, %14, %c0_i32_7 : i32
    scf.if %15 {
      %19 = tpu.iota {dimensions = array<i32: 0>} : vector<32x128xi32>
      %c128_i32 = arith.constant 128 : i32
      %20 = vector.broadcast %c128_i32 : i32 to vector<32x128xi32>
      %21 = arith.muli %19, %20 : vector<32x128xi32>
      %22 = tpu.iota {dimensions = array<i32: 1>} : vector<32x128xi32>
      %23 = arith.addi %21, %22 : vector<32x128xi32>
      %c128_i32_10 = arith.constant 128 : i32
      %24 = vector.broadcast %c128_i32_10 : i32 to vector<32x128xi32>
      %25 = arith.cmpi slt, %23, %24 : vector<32x128xi32>
      %26 = arith.andi %5, %25 : vector<32x128xi1>
      %cst_11 = arith.constant 0.000000e+00 : f32
      %27 = vector.broadcast %cst_11 : f32 to vector<32x128xf32>
      %28 = arith.select %26, %3, %27 : vector<32x128xi1>, vector<32x128xf32>
      %c0_12 = arith.constant 0 : index
      %c0_13 = arith.constant 0 : index
      %29 = vector.load %arg5[%c0_12, %c0_13] : memref<8x128xf32, #tpu.memory_space<vmem>>, vector<8x128xf32>
      %30 = vector.shape_cast %28 : vector<32x128xf32> to vector<4x8x128xf32>
      %cst_14 = arith.constant dense<0.000000e+00> : vector<8x128xf32>
      %31 = vector.multi_reduction <add>, %30, %cst_14 [0] : vector<4x8x128xf32> to vector<8x128xf32>
      %32 = arith.addf %29, %31 : vector<8x128xf32>
      %c0_15 = arith.constant 0 : index
      %c0_16 = arith.constant 0 : index
      %33 = vector.load %arg5[%c0_15, %c0_16] : memref<8x128xf32, #tpu.memory_space<vmem>>, vector<8x128xf32>
      tpu.vector_store %arg5[%c0_15, %c0_16], %32 {strides = array<i32>} : memref<8x128xf32, #tpu.memory_space<vmem>>, vector<8x128xf32>,
    } else {
    }
    %c0_i32_8 = arith.constant 0 : i32
    %16 = arith.cmpi eq, %arg1, %c0_i32_8 : i32
    %17 = arith.extui %16 : i1 to i32
    %c0_i32_9 = arith.constant 0 : i32
    %18 = arith.cmpi ne, %17, %c0_i32_9 : i32
    scf.if %18 {
      %c0_10 = arith.constant 0 : index
      %c0_11 = arith.constant 0 : index
      %19 = vector.load %arg5[%c0_10, %c0_11] : memref<8x128xf32, #tpu.memory_space<vmem>>, vector<8x128xf32>
      %20 = vector.shape_cast %19 : vector<8x128xf32> to vector<1x8x128xf32>
      %cst_12 = arith.constant dense<0.000000e+00> : vector<1xf32>
      %21 = vector.multi_reduction <add>, %20, %cst_12 [1, 2] : vector<1x8x128xf32> to vector<1xf32>
      %22 = vector.shape_cast %21 : vector<1xf32> to vector<1x1x1xf32>
      %23 = vector.extract %22[0, 0, 0] : f32 from vector<1x1x1xf32>
      %24 = vector.broadcast %23 : f32 to vector<1x1x1xf32>
      %c0_13 = arith.constant 0 : index
      %c0_14 = arith.constant 0 : index
      %c0_15 = arith.constant 0 : index
      %25 = vector.load %arg4[%c0_13, %c0_14, %c0_15] : memref<1x1x1xf32, #tpu.memory_space<vmem>>, vector<1x1x1xf32>
      tpu.vector_store %arg4[%c0_13, %c0_14, %c0_15], %24 {strides = array<i32>} : memref<1x1x1xf32, #tpu.memory_space<vmem>>, vector<1x1x1xf32>,
    } else {
    }
    return
  }
  func.func @transform_0(%arg0: i32, %arg1: i32) -> (i32, i32) {
    %c1_i32 = arith.constant 1 : i32
    %0 = arith.muli %arg0, %c1_i32 : i32
    %1 = arith.addi %0, %arg1 : i32
    %c0_i32 = arith.constant 0 : i32
    %2 = arith.minsi %1, %c0_i32 : i32
    %c0_i32_0 = arith.constant 0 : i32
    %c0_i32_1 = arith.constant 0 : i32
    return %2, %c0_i32_0 : i32, i32
  }
  func.func @transform_1(%arg0: i32, %arg1: i32) -> (i32, i32) {
    %c1_i32 = arith.constant 1 : i32
    %0 = arith.muli %arg0, %c1_i32 : i32
    %1 = arith.addi %0, %arg1 : i32
    %c0_i32 = arith.constant 0 : i32
    %2 = arith.minsi %1, %c0_i32 : i32
    %c0_i32_0 = arith.constant 0 : i32
    %c0_i32_1 = arith.constant 0 : i32
    return %2, %c0_i32_0 : i32, i32
  }
  func.func @transform_2(%arg0: i32, %arg1: i32) -> (i32, i32, i32) {
    %c0_i32 = arith.constant 0 : i32
    %c0_i32_0 = arith.constant 0 : i32
    %c0_i32_1 = arith.constant 0 : i32
    return %arg0, %c0_i32, %c0_i32_0 : i32, i32, i32
  }
}

</mosaic_0001>

<bundles_post_ra>
// kernel: tpu_custom_call.1
= control target key start
LH: loop header
LB: loop body
LE: loop exit
PB: predicated region body
PF: predicated region fallthrough
CT: control target
= control target key end

     0   :  { %7 = vsyncpa [#allocation4], 0  ;;  %s272_s0 = inlined_call_operand.hbm [shape: f32[1,128], index: 0, kind: input, shape index: {}]   ;;  %s273_s1 = inlined_call_operand.vmem [shape: f32[1,128], index: 1, kind: input, shape index: {}]   ;;  %s274_s2 = inlined_call_operand.hbm [shape: f32[1,1,1], index: 2, kind: output, shape index: {}]  }
   0x1   :  { %8 = vsyncpa [#allocation5], 0 }
   0x2   :  { %19 = vsyncadd [#allocation4], 496  ;;  %s235_s9 = smov [#allocation3]  }
   0x3   :  { %s23_s10 = sshll.u32 %s235_s9, 4  ;;  %s24_s10 = int_to_ptr.vmem [resolvable:$true] %s23_s10 }
   0x4   :  { %s199_s11 = scalar_lea.vmem %s24_s10, 16  ;;  %s203_s12 = scalar_lea.vmem %s24_s10, 512 }
   0x5   :  { %p200_p0 = scmp.ne.s32.totalorder %s24_s10, %s199_s11  ;;  %p204_p1 = scmp.lt.s32.totalorder %s24_s10, %s24_s10 }
   0x6   :  { %p205_p2 = scmp.lt.s32.totalorder %s203_s12, %s199_s11 }
   0x8   :  { %p206_p3 = por %p205_p2, %p204_p1 }
   0xa   :  { %p207_p4 = pnand %p206_p3, %p200_p0 }
   0xc   :  { %210 = shalt.err (!%p207_p4)
}
   0xd   :  { %s236_s13 = smov 16   ;;  %s237_s14 = smov 1  }
   0xe   :  { %29 = dma.hbm_to_vmem [thread:$0]  %s272_s0, 16, %s24_s10, [#allocation4], %s236_s13, %s236_s13, %s237_s14  }
   0xf   :  { %231 = dma.done.wait [#allocation4], 512  }
  0x10   :  { %232 = vsyncadd [#allocation4], 4294966784  ;;  %v116_v0 = vlaneseq  ;;  %v85_v10 = vld [vmem:[#allocation3] sm:$0xff]  ;;  %v86_v11 = vld [vmem:[#allocation3 + $0x8] sm:$0xff]  ;;  %vm163_vm12 = vcmask 0  }
  0x11   :  { %v87_v12 = vld [vmem:[#allocation3 + $0x10] sm:$0xff]  ;;  %v88_v14 = vld [vmem:[#allocation3 + $0x18] sm:$0xff]  ;;  %v89_v15 = vld [vmem:[%s273_s1] sm:$0xff] }
  0x12   :  { %v117_v1 = vshrl.u32 %v116_v0, 7  ;;  %v126_v2 = vand.u32 127, %v116_v0  ;;  %v90_v16 = vld [vmem:[%s273_s1 + $0x8] sm:$0xff]  ;;  %v91_v19 = vld [vmem:[%s273_s1 + $0x10] sm:$0xff]  ;;  %v92_v20 = vld [vmem:[%s273_s1 + $0x18] sm:$0xff]  ;;  %vm93_vm1 = vcmp.lt.f32.partialorder %v85_v10, %v89_v15  ;;  %s238_s1 = smov [#allocation6]  }
  0x13   :  { %vm94_vm2 = vcmp.lt.f32.partialorder %v86_v11, %v90_v16  ;;  %vm95_vm3 = vcmp.lt.f32.partialorder %v87_v12, %v91_v19  ;;  %vm96_vm4 = vcmp.lt.f32.partialorder %v88_v14, %v92_v20  ;;  %s171_s24 = sshll.u32 %s238_s1, 4  ;;  %s172_s24 = int_to_ptr.vmem [resolvable:$true] %s171_s24 }
  0x14   :  { %v118_v3 = vadd.s32 8, %v117_v1  ;;  %v119_v4 = vadd.s32 16, %v117_v1  ;;  %v120_v5 = vadd.s32 24, %v117_v1  ;;  %v121_v6 = vmul.u32 128, %v117_v1  ;;  %s211_s26 = scalar_lea.vmem %s172_s24, 16  ;;  %s215_s27 = scalar_lea.vmem %s172_s24, 32 }
  0x15   :  { %p212_p5 = scmp.ne.s32.totalorder %s172_s24, %s211_s26  ;;  %p216_p6 = scmp.lt.s32.totalorder %s172_s24, %s172_s24 }
  0x16   :  { %v122_v7 = vmul.u32 128, %v118_v3  ;;  %v123_v8 = vmul.u32 128, %v119_v4  ;;  %v127_v9 = vadd.s32 %v126_v2, %v121_v6  ;;  %p217_p7 = scmp.lt.s32.totalorder %s215_s27, %s211_s26 }
  0x17   :  { %v124_v13 = vmul.u32 128, %v120_v5 }
  0x18   :  { %v128_v17 = vadd.s32 %v126_v2, %v122_v7  ;;  %v129_v18 = vadd.s32 %v126_v2, %v123_v8  ;;  %vm131_vm0 = vcmp.lt.s32.totalorder %v127_v9, 128  ;;  %p218_p8 = por %p217_p7, %p216_p6 }
  0x19   :  { %v130_v21 = vadd.s32 %v126_v2, %v124_v13  ;;  %vm135_vm7 = vmand %vm93_vm1, %vm131_vm0 }
  0x1a   :  { %vm132_vm5 = vcmp.lt.s32.totalorder %v128_v17, 128  ;;  %vm133_vm6 = vcmp.lt.s32.totalorder %v129_v18, 128  ;;  %v139_v22 = vsel %vm135_vm7, %v85_v10, 0.0  ;;  %p219_p9 = pnand %p218_p8, %p212_p5 }
  0x1b   :  { %vm134_vm8 = vcmp.lt.s32.totalorder %v130_v21, 128  ;;  %vm136_vm9 = vmand %vm94_vm2, %vm132_vm5 }
  0x1c   :  { %vm137_vm10 = vmand %vm95_vm3, %vm133_vm6  ;;  %v140_v23 = vsel %vm136_vm9, %v86_v11, 0.0 }
  0x1d   :  { %vm138_vm11 = vmand %vm96_vm4, %vm134_vm8  ;;  %v141_v24 = vsel %vm137_vm10, %v87_v12, 0.0  ;;  %v144_v25 = vadd.f32 %v140_v23, %v139_v22 }
  0x1e   :  { %v142_v26 = vsel %vm138_vm11, %v88_v14, 0.0 }
  0x1f   :  { %v145_v27 = vadd.f32 %v144_v25, %v141_v24 }
  0x21   :  { %v146_v28 = vadd.f32 %v145_v27, %v142_v26 }
  0x23   :  { %153 = vadd.xlane.f32.xlu0 %v146_v28 }
  0xac   :  { %v154_v29 = vpop.xlane.xlu0 %153 }
  0xad   :  { %v155_v30 = vrot.slane %v154_v29, 4 }
  0xaf   :  { %v156_v31 = vadd.f32 %v155_v30, %v154_v29 }
  0xb1   :  { %v157_v32 = vrot.slane %v156_v31, 2 }
  0xb3   :  { %v158_v33 = vadd.f32 %v157_v32, %v156_v31 }
  0xb5   :  { %v159_v34 = vrot.slane %v158_v33, 1 }
  0xb7   :  { %v160_v35 = vadd.f32 %v159_v34, %v158_v33 }
  0xb9   :  { %185 = vpush %v160_v35 }
  0xea   :  { %s186_s25 = spop %185 }
  0xeb   :  { %v162_v36 = vstv %s186_s25 }
  0xec   :  { %164 = vst.msk [vmem:[#allocation6] sm:$0x1] %vm163_vm12, %v162_v36 }
  0xed   :  { %222 = shalt.err (!%p219_p9)
}
  0xee   :  { %174 = dma.vmem_to_hbm [thread:$0]  %s172_s24, 16, %s274_s2, [#allocation5]  }
  0xef   :  { %233 = dma.done.wait [#allocation5], 16  }
  0xf0   :  { %234 = vsyncadd [#allocation5], 4294967280 }
  0xf1   :  { %178 = vsyncpa [#allocation4], 1 }
  0xf2   :  { %179 = vsyncpa [#allocation5], 1 }

</bundles_post_ra>
